<compile_context>
chip_gen: v7x
topology: tpu7x:2x2x1
jax: 0.10.0
libtpu: 0.0.40
codegen_flags: <defaults>
</compile_context>

<pallas_src>
import numpy as np
import jax
import jax.numpy as jnp
from jax import lax
from jax.experimental import pallas as pl
from jax.experimental.pallas import tpu as pltpu


def _round_up(a, b):
    return (a + b - 1) // b * b


def _cdiv(a, b):
    return (a + b - 1) // b


def transition_kernel(x_ref, scale_ref, shift_ref, w_ref, o_ref):
    # x_ref:     (4, TM, Cin) bf16 — four 2x2-pool taps for TM output pixels, channels on lanes
    # scale_ref: (1, Cin) f32  — folded BN scale * 0.25 (pool factor included)
    # shift_ref: (1, Cin) f32  — folded BN shift * 0.25
    # w_ref:     (Cin, Cop) bf16 — 1x1 conv weight (transposed, Cout lane-padded)
    # o_ref:     (TM, Cop) — lane-dense output rows
    scale = scale_ref[...]
    shift = shift_ref[...]
    # BN + ReLU per tap (bf16 load -> f32 math), then 2x2 average pool as plain VPU adds.
    # The 1/4 pooling factor is already folded into scale/shift.
    z = jnp.maximum(x_ref[0].astype(jnp.float32) * scale + shift, 0.0)
    z = z + jnp.maximum(x_ref[1].astype(jnp.float32) * scale + shift, 0.0)
    z = z + jnp.maximum(x_ref[2].astype(jnp.float32) * scale + shift, 0.0)
    z = z + jnp.maximum(x_ref[3].astype(jnp.float32) * scale + shift, 0.0)
    # Pool-before-conv: the 1x1 conv is pointwise-linear, so it commutes with avg-pool,
    # giving 4x fewer MXU FLOPs.  bf16 operands, f32 accumulation.
    y = jnp.dot(z.astype(w_ref.dtype), w_ref[...], preferred_element_type=jnp.float32)
    o_ref[...] = y.astype(o_ref.dtype)


def transition_forward(x_nchw, gamma, beta, conv_w, eps=1e-5,
                       matmul_dtype=jnp.bfloat16, nchw_output=True):
    """x_nchw: (N, Cin, H, W); conv_w: (Cout, Cin, 1, 1). Returns (N, Cout, H//2, W//2)."""
    N, Cin, H, W = x_nchw.shape
    Cout = conv_w.shape[0]
    assert H % 2 == 0 and W % 2 == 0
    Ho, Wo = H // 2, W // 2
    R = N * Ho * Wo

    # --- Training-mode BatchNorm batch statistics (biased variance), single fused pass over x.
    #     var = E[x^2] - mean^2, accumulated in f32 (inputs are f32, cancellation is benign here).
    xf = x_nchw.astype(jnp.float32)
    mean = jnp.mean(xf, axis=(0, 2, 3))
    mean_sq = jnp.mean(xf * xf, axis=(0, 2, 3))
    var = jnp.maximum(mean_sq - mean * mean, 0.0)
    inv_std = gamma.astype(jnp.float32) * lax.rsqrt(var + eps)
    # Fold the 0.25 avg-pool factor into scale/shift (ReLU(0.25 t) == 0.25 ReLU(t)).
    scale = (inv_std * 0.25).reshape(1, Cin).astype(jnp.float32)
    shift = ((beta.astype(jnp.float32) - mean * inv_std) * 0.25).reshape(1, Cin).astype(jnp.float32)

    # --- Expose the 2x2 pooling taps as a leading size-4 axis and flatten (N, Ho, Wo) into one
    #     row axis.  Cast to bf16 inside the same transpose copy — no separate padded copy of
    #     the big tensor (channels stay at Cin; full-dim BlockSpec last dim is legal, and the
    #     cdiv row grid handles non-divisible rows via OOB masking).
    x_taps = jnp.transpose(
        x_nchw.astype(matmul_dtype).reshape(N, Cin, Ho, 2, Wo, 2), (3, 5, 0, 2, 4, 1)
    ).reshape(4, R, Cin)

    # Only the small operands get lane padding: weight N-dim / output to multiples of 128 so the
    # output store is lane-dense (unmasked vst).  Zero-padded weight columns are a semantic no-op.
    Cop = _round_up(Cout, 128)
    # TODO(synk): groups > 1 would be handled by building a block-diagonal weight here.
    w_mat = jnp.pad(conv_w[:, :, 0, 0].T, ((0, 0), (0, Cop - Cout))).astype(matmul_dtype)

    # --- Generation-aware row tile from the VMEM budget (v5e/v6e: 128 MiB, v7x: 64 MiB).
    try:
        vmem_cap = int(pltpu.get_tpu_info().vmem_capacity_bytes)
    except Exception:
        vmem_cap = 64 * 1024 * 1024  # conservative (v7x-sized) fallback
    budget = int(vmem_cap * 0.72)
    in_isz = jnp.dtype(matmul_dtype).itemsize
    out_isz = jnp.dtype(x_nchw.dtype).itemsize
    w_bytes = Cin * Cop * in_isz

    def working_set(tm):
        x_blk = 4 * tm * Cin * in_isz                   # input block (double-buffered)
        o_blk = tm * Cop * out_isz                      # output block (double-buffered)
        tmp = tm * Cin * (4 + in_isz) + tm * Cop * 4    # f32 z, bf16 cast copy, f32 accumulator
        return 2 * (x_blk + o_blk) + 2 * w_bytes + tmp + (2 << 20)

    tm = 1024 if vmem_cap >= (100 << 20) else 512       # big-VMEM gens get the larger tile
    while tm > 64 and working_set(tm) > budget:
        tm -= 128
    tm = max(tm, 8)
    # Keep the grid step count even (>= 2 when there is enough work) so both v7x TensorCores
    # get balanced, pipelineable work.
    n_steps = _cdiv(R, tm)
    if n_steps > 1 and n_steps % 2 == 1:
        n_steps += 1
    tm = min(tm, _round_up(_cdiv(R, n_steps), 8))
    grid = _cdiv(R, tm)

    # Never clamp the VMEM limit below the working-set estimate.
    vmem_limit = max(working_set(tm) + (2 << 20), 32 << 20)
    vmem_limit = int(min(vmem_limit, int(vmem_cap * 0.94)))

    def resident_spec(block_shape):
        # Grid-invariant operands (constant index_map): single buffer, no pointless
        # double-buffering of the weight/scale/shift.
        idx_map = lambda i: (0,) * len(block_shape)
        try:
            return pl.BlockSpec(block_shape, idx_map, pipeline_mode=pl.Buffered(1))
        except Exception:
            return pl.BlockSpec(block_shape, idx_map)

    out = pl.pallas_call(
        transition_kernel,
        out_shape=jax.ShapeDtypeStruct((R, Cop), x_nchw.dtype),
        grid_spec=pl.GridSpec(
            grid=(grid,),
            in_specs=[
                pl.BlockSpec((4, tm, Cin), lambda i: (0, i, 0)),
                resident_spec((1, Cin)),
                resident_spec((1, Cin)),
                resident_spec((Cin, Cop)),
            ],
            out_specs=pl.BlockSpec((tm, Cop), lambda i: (i, 0)),
        ),
        compiler_params=pltpu.CompilerParams(
            dimension_semantics=("parallel",),
            vmem_limit_bytes=vmem_limit,
        ),
    )(x_taps, scale, shift, w_mat)

    # (R, Cop) -> strip lane padding -> (N, Ho, Wo, Cout) [-> NCHW].
    out = out[:, :Cout].reshape(N, Ho, Wo, Cout)
    if nchw_output:
        out = jnp.transpose(out, (0, 3, 1, 2))
    return out


def transition_reference(x, gamma, beta, conv_w, eps=1e-5):
    # Pure-f32 reference with the *original* op order: BN -> ReLU -> conv at full resolution,
    # then avg-pool — also validates the pool/conv commutation and BN/pool folding in the kernel.
    mean = jnp.mean(x, axis=(0, 2, 3), keepdims=True)
    var = jnp.mean((x - mean) ** 2, axis=(0, 2, 3), keepdims=True)
    z = (x - mean) / jnp.sqrt(var + eps)
    z = z * gamma[None, :, None, None] + beta[None, :, None, None]
    z = jnp.maximum(z, 0.0)
    y = jnp.einsum('nchw,oc->nohw', z, conv_w[:, :, 0, 0])
    N, Co, H, W = y.shape
    return y.reshape(N, Co, H // 2, 2, W // 2, 2).mean(axis=(3, 5))


if __name__ == "__main__":
    # Small deterministic setup: batch=2, in_planes=4, out_planes=8, 16x16 spatial.
    N, Cin, Cout, H, W = 2, 4, 8, 16, 16
    key = jax.random.PRNGKey(0)
    kx, kg, kb, kw = jax.random.split(key, 4)

    x = jax.random.normal(kx, (N, Cin, H, W), dtype=jnp.float32)
    gamma = 1.0 + 0.1 * jax.random.normal(kg, (Cin,), dtype=jnp.float32)  # BN weight
    beta = 0.1 * jax.random.normal(kb, (Cin,), dtype=jnp.float32)          # BN bias
    # Conv2d kaiming-uniform-ish deterministic init, bias=False.
    bound = 1.0 / np.sqrt(Cin * 1 * 1)
    conv_w = jax.random.uniform(kw, (Cout, Cin, 1, 1), dtype=jnp.float32,
                                minval=-bound, maxval=bound)

    out = transition_forward(x, gamma, beta, conv_w)
    out = jax.block_until_ready(out)

    ref = transition_reference(x, gamma, beta, conv_w)
    assert out.shape == (N, Cout, H // 2, W // 2), out.shape
    # Tolerance accounts for bf16 activation loads and bf16 matmul operands (f32 accumulation);
    # BN/ReLU/pool arithmetic is f32.
    np.testing.assert_allclose(np.asarray(out), np.asarray(ref), rtol=2e-2, atol=2e-2)

    print("KERNEL_OK")
</pallas_src>

<mosaic_0001>
module attributes {stable_mosaic.version = 11 : i64} {
  func.func @transition_kernel(%arg0: i32, %arg1: memref<4x128x4xbf16, #tpu.memory_space<vmem>>, %arg2: memref<1x4xf32, #tpu.memory_space<vmem>>, %arg3: memref<1x4xf32, #tpu.memory_space<vmem>>, %arg4: memref<4x128xbf16, #tpu.memory_space<vmem>>, %arg5: memref<128x128xf32, #tpu.memory_space<vmem>>) attributes {dimension_semantics = [#tpu.dimension_semantics<parallel>], iteration_bounds = array<i64: 1>, scalar_prefetch = 0 : i64, scratch_operands = 0 : i64, tpu.core_type = #tpu.core_type<tc>, window_params = [{transform_indices = @transform_0, window_bounds = array<i64: 4, 128, 4>}, {pipeline_mode = #tpu.pipeline_mode<synchronous>, transform_indices = @transform_1, window_bounds = array<i64: 1, 4>}, {pipeline_mode = #tpu.pipeline_mode<synchronous>, transform_indices = @transform_2, window_bounds = array<i64: 1, 4>}, {pipeline_mode = #tpu.pipeline_mode<synchronous>, transform_indices = @transform_3, window_bounds = array<i64: 4, 128>}, {transform_indices = @transform_4, window_bounds = array<i64: 128, 128>}]} {
    %c0 = arith.constant 0 : index
    %c0_0 = arith.constant 0 : index
    %0 = vector.load %arg2[%c0, %c0_0] : memref<1x4xf32, #tpu.memory_space<vmem>>, vector<1x4xf32>
    %c0_1 = arith.constant 0 : index
    %c0_2 = arith.constant 0 : index
    %1 = vector.load %arg3[%c0_1, %c0_2] : memref<1x4xf32, #tpu.memory_space<vmem>>, vector<1x4xf32>
    %c0_3 = arith.constant 0 : index
    %c0_4 = arith.constant 0 : index
    %c0_5 = arith.constant 0 : index
    %2 = vector.load %arg1[%c0_3, %c0_4, %c0_5] : memref<4x128x4xbf16, #tpu.memory_space<vmem>>, vector<1x128x4xbf16>
    %3 = vector.shape_cast %2 : vector<1x128x4xbf16> to vector<128x4xbf16>
    %4 = arith.extf %3 : vector<128x4xbf16> to vector<128x4xf32>
    %5 = vector.broadcast %0 : vector<1x4xf32> to vector<128x4xf32>
    %6 = arith.mulf %4, %5 : vector<128x4xf32>
    %7 = vector.broadcast %1 : vector<1x4xf32> to vector<128x4xf32>
    %8 = arith.addf %6, %7 : vector<128x4xf32>
    %cst = arith.constant 0.000000e+00 : f32
    %9 = vector.broadcast %cst : f32 to vector<128x4xf32>
    %10 = arith.maximumf %8, %9 : vector<128x4xf32>
    %c1 = arith.constant 1 : index
    %c0_6 = arith.constant 0 : index
    %c0_7 = arith.constant 0 : index
    %11 = vector.load %arg1[%c1, %c0_6, %c0_7] : memref<4x128x4xbf16, #tpu.memory_space<vmem>>, vector<1x128x4xbf16>
    %12 = vector.shape_cast %11 : vector<1x128x4xbf16> to vector<128x4xbf16>
    %13 = arith.extf %12 : vector<128x4xbf16> to vector<128x4xf32>
    %14 = vector.broadcast %0 : vector<1x4xf32> to vector<128x4xf32>
    %15 = arith.mulf %13, %14 : vector<128x4xf32>
    %16 = vector.broadcast %1 : vector<1x4xf32> to vector<128x4xf32>
    %17 = arith.addf %15, %16 : vector<128x4xf32>
    %cst_8 = arith.constant 0.000000e+00 : f32
    %18 = vector.broadcast %cst_8 : f32 to vector<128x4xf32>
    %19 = arith.maximumf %17, %18 : vector<128x4xf32>
    %20 = arith.addf %10, %19 : vector<128x4xf32>
    %c2 = arith.constant 2 : index
    %c0_9 = arith.constant 0 : index
    %c0_10 = arith.constant 0 : index
    %21 = vector.load %arg1[%c2, %c0_9, %c0_10] : memref<4x128x4xbf16, #tpu.memory_space<vmem>>, vector<1x128x4xbf16>
    %22 = vector.shape_cast %21 : vector<1x128x4xbf16> to vector<128x4xbf16>
    %23 = arith.extf %22 : vector<128x4xbf16> to vector<128x4xf32>
    %24 = vector.broadcast %0 : vector<1x4xf32> to vector<128x4xf32>
    %25 = arith.mulf %23, %24 : vector<128x4xf32>
    %26 = vector.broadcast %1 : vector<1x4xf32> to vector<128x4xf32>
    %27 = arith.addf %25, %26 : vector<128x4xf32>
    %cst_11 = arith.constant 0.000000e+00 : f32
    %28 = vector.broadcast %cst_11 : f32 to vector<128x4xf32>
    %29 = arith.maximumf %27, %28 : vector<128x4xf32>
    %30 = arith.addf %20, %29 : vector<128x4xf32>
    %c3 = arith.constant 3 : index
    %c0_12 = arith.constant 0 : index
    %c0_13 = arith.constant 0 : index
    %31 = vector.load %arg1[%c3, %c0_12, %c0_13] : memref<4x128x4xbf16, #tpu.memory_space<vmem>>, vector<1x128x4xbf16>
    %32 = vector.shape_cast %31 : vector<1x128x4xbf16> to vector<128x4xbf16>
    %33 = arith.extf %32 : vector<128x4xbf16> to vector<128x4xf32>
    %34 = vector.broadcast %0 : vector<1x4xf32> to vector<128x4xf32>
    %35 = arith.mulf %33, %34 : vector<128x4xf32>
    %36 = vector.broadcast %1 : vector<1x4xf32> to vector<128x4xf32>
    %37 = arith.addf %35, %36 : vector<128x4xf32>
    %cst_14 = arith.constant 0.000000e+00 : f32
    %38 = vector.broadcast %cst_14 : f32 to vector<128x4xf32>
    %39 = arith.maximumf %37, %38 : vector<128x4xf32>
    %40 = arith.addf %30, %39 : vector<128x4xf32>
    %41 = arith.truncf %40 : vector<128x4xf32> to vector<128x4xbf16>
    %c0_15 = arith.constant 0 : index
    %c0_16 = arith.constant 0 : index
    %42 = vector.load %arg4[%c0_15, %c0_16] : memref<4x128xbf16, #tpu.memory_space<vmem>>, vector<4x128xbf16>
    %cst_17 = arith.constant dense<0.000000e+00> : vector<128x128xf32>
    %43 = tpu.matmul %41, %42, %cst_17 {dimension_numbers = #tpu.dot_dimension_numbers<[1], [0], [0], [1], [0, 0, 1, 1], [], []>} : vector<128x4xbf16>, vector<4x128xbf16>, vector<128x128xf32> -> vector<128x128xf32>
    %c0_18 = arith.constant 0 : index
    %c0_19 = arith.constant 0 : index
    %44 = vector.load %arg5[%c0_18, %c0_19] : memref<128x128xf32, #tpu.memory_space<vmem>>, vector<128x128xf32>
    tpu.vector_store %arg5[%c0_18, %c0_19], %43 {strides = array<i32>} : memref<128x128xf32, #tpu.memory_space<vmem>>, vector<128x128xf32>,
    return
  }
  func.func @transform_0(%arg0: i32) -> (i32, i32, i32) {
    %c0_i32 = arith.constant 0 : i32
    %c0_i32_0 = arith.constant 0 : i32
    %c0_i32_1 = arith.constant 0 : i32
    return %c0_i32, %arg0, %c0_i32_0 : i32, i32, i32
  }
  func.func @transform_1(%arg0: i32) -> (i32, i32) {
    %c0_i32 = arith.constant 0 : i32
    %c0_i32_0 = arith.constant 0 : i32
    %c0_i32_1 = arith.constant 0 : i32
    return %c0_i32, %c0_i32_0 : i32, i32
  }
  func.func @transform_2(%arg0: i32) -> (i32, i32) {
    %c0_i32 = arith.constant 0 : i32
    %c0_i32_0 = arith.constant 0 : i32
    %c0_i32_1 = arith.constant 0 : i32
    return %c0_i32, %c0_i32_0 : i32, i32
  }
  func.func @transform_3(%arg0: i32) -> (i32, i32) {
    %c0_i32 = arith.constant 0 : i32
    %c0_i32_0 = arith.constant 0 : i32
    %c0_i32_1 = arith.constant 0 : i32
    return %c0_i32, %c0_i32_0 : i32, i32
  }
  func.func @transform_4(%arg0: i32) -> (i32, i32) {
    %c0_i32 = arith.constant 0 : i32
    %c0_i32_0 = arith.constant 0 : i32
    return %arg0, %c0_i32 : i32, i32
  }
}

</mosaic_0001>

<bundles_post_ra>
// kernel: tpu_custom_call.1
= control target key start
LH: loop header
LB: loop body
LE: loop exit
PB: predicated region body
PF: predicated region fallthrough
CT: control target
= control target key end

     0   :  { %vm438_vm0 = vcmask 1041408   ;;  %vm413_vm1 = vcmask 31744   ;;  %s1131_s0 = inlined_call_operand.vmem [shape: bf16[4,128,4], index: 0, kind: input, shape index: {}]   ;;  %s1132_s1 = inlined_call_operand.vmem [shape: f32[1,4], index: 1, kind: input, shape index: {}]   ;;  %s1133_s2 = inlined_call_operand.vmem [shape: f32[1,4], index: 2, kind: input, shape index: {}]   ;;  %s1134_s3 = inlined_call_operand.vmem [shape: bf16[4,128], index: 3, kind: input, shape index: {}]   ;;  %s1135_s4 = inlined_call_operand.hbm [shape: f32[128,128], index: 4, kind: output, shape index: {}]  }
   0x1   :  { %v412_v0 = vld [vmem:[%s1134_s3] sm:$0x3] }
   0x2   :  { %v880_v1 = vld [vmem:[%s1132_s1] ss:$0 sm:$0xff]  ;;  %817 = vmatprep.subr.msk.bf16.mxu0 %vm438_vm0, %v412_v0  ;;  %818 = vmatprep.subr.msk.bf16.mxu1 %vm438_vm0, %v412_v0  ;;  %v440_v3 = vsel %vm438_vm0, %v412_v0, 0 }
   0x3   :  { %v630_v2 = vld [vmem:[%s1131_s0] sm:$0xff]   ;;  %798 = vmatpush3.bf16.msra.mxu0 %v440_v3  ;;  %816 = vmatpush3.bf16.msra.mxu1 %v440_v3 }
   0x4   :  { %v631_v4 = vunpack.c.l.bf16 %v630_v2  ;;  %v632_v5 = vunpack.c.h.bf16 %v630_v2  ;;  %v764_v6 = vld [vmem:[%s1131_s0 + $0x40] sm:$0xff]  }
   0x5   :  { %v772_v7 = vld [vmem:[%s1131_s0 + $0x80] sm:$0xff]   ;;  %v663_v9 = vunpack.c.l.bf16 %v764_v6  ;;  %v664_v10 = vunpack.c.h.bf16 %v764_v6 }
   0x6   :  { %v894_v8 = vld [vmem:[%s1133_s2] ss:$0 sm:$0xff]  ;;  %v695_v11 = vunpack.c.l.bf16 %v772_v7  ;;  %v696_v12 = vunpack.c.h.bf16 %v772_v7  ;;  %v59_v14 = vmul.f32 %v631_v4, %v880_v1  ;;  %v60_v15 = vmul.f32 %v632_v5, %v880_v1 }
   0x7   :  { %v780_v13 = vld [vmem:[%s1131_s0 + $0xc0] sm:$0xff]   ;;  %v146_v18 = vmul.f32 %v663_v9, %v880_v1  ;;  %v147_v19 = vmul.f32 %v664_v10, %v880_v1 }
   0x8   :  { %v727_v16 = vunpack.c.l.bf16 %v780_v13  ;;  %v728_v17 = vunpack.c.h.bf16 %v780_v13  ;;  %v243_v20 = vmul.f32 %v695_v11, %v880_v1  ;;  %v244_v21 = vmul.f32 %v696_v12, %v880_v1  ;;  %v760_v30 = vld [vmem:[%s1131_s0 + $0x20] sm:$0xff]  }
   0x9   :  { %v81_v22 = vadd.f32 %v894_v8, %v59_v14  ;;  %v82_v23 = vadd.f32 %v894_v8, %v60_v15  ;;  %v162_v26 = vadd.f32 %v894_v8, %v146_v18  ;;  %v163_v27 = vadd.f32 %v894_v8, %v147_v19  ;;  %v768_v35 = vld [vmem:[%s1131_s0 + $0x60] sm:$0xff]  }
   0xa   :  { %v340_v24 = vmul.f32 %v727_v16, %v880_v1  ;;  %v341_v25 = vmul.f32 %v728_v17, %v880_v1  ;;  %v259_v28 = vadd.f32 %v894_v8, %v243_v20  ;;  %v260_v29 = vadd.f32 %v894_v8, %v244_v21  ;;  %v776_v40 = vld [vmem:[%s1131_s0 + $0xa0] sm:$0xff]  }
   0xb   :  { %v97_v31 = vmax.f32 %v81_v22, 0.0  ;;  %v98_v32 = vmax.f32 %v82_v23, 0.0  ;;  %v178_v36 = vmax.f32 %v162_v26, 0.0  ;;  %v179_v37 = vmax.f32 %v163_v27, 0.0 }
   0xc   :  { %v356_v33 = vadd.f32 %v894_v8, %v340_v24  ;;  %v357_v34 = vadd.f32 %v894_v8, %v341_v25  ;;  %v275_v38 = vmax.f32 %v259_v28, 0.0  ;;  %v276_v39 = vmax.f32 %v260_v29, 0.0 }
   0xd   :  { %v647_v43 = vunpack.c.l.bf16 %v760_v30  ;;  %v648_v44 = vunpack.c.h.bf16 %v760_v30  ;;  %v194_v45 = vadd.f32 %v178_v36, %v97_v31  ;;  %v195_v46 = vadd.f32 %v179_v37, %v98_v32 }
   0xe   :  { %v372_v41 = vmax.f32 %v356_v33, 0.0  ;;  %v373_v42 = vmax.f32 %v357_v34, 0.0  ;;  %v679_v47 = vunpack.c.l.bf16 %v768_v35  ;;  %v680_v48 = vunpack.c.h.bf16 %v768_v35 }
   0xf   :  { %v67_v49 = vmul.f32 %v647_v43, %v880_v1  ;;  %v68_v50 = vmul.f32 %v648_v44, %v880_v1  ;;  %v711_v51 = vunpack.c.l.bf16 %v776_v40  ;;  %v712_v52 = vunpack.c.h.bf16 %v776_v40 }
  0x10   :  { %v291_v53 = vadd.f32 %v275_v38, %v194_v45  ;;  %v292_v54 = vadd.f32 %v276_v39, %v195_v46  ;;  %v154_v55 = vmul.f32 %v679_v47, %v880_v1  ;;  %v155_v56 = vmul.f32 %v680_v48, %v880_v1 }
  0x11   :  { %9 = vsyncpa [#allocation3], 0  ;;  %v89_v57 = vadd.f32 %v894_v8, %v67_v49  ;;  %v90_v58 = vadd.f32 %v894_v8, %v68_v50  ;;  %v251_v59 = vmul.f32 %v711_v51, %v880_v1  ;;  %v252_v60 = vmul.f32 %v712_v52, %v880_v1  ;;  %v784_v61 = vld [vmem:[%s1131_s0 + $0xe0] sm:$0xff]   ;;  %v757_v3 = vld [vmem:[%s1131_s0 + $0x8] sm:$0xff]  }
  0x12   :  { %v388_v62 = vadd.f32 %v372_v41, %v291_v53  ;;  %v389_v63 = vadd.f32 %v373_v42, %v292_v54  ;;  %v170_v0 = vadd.f32 %v894_v8, %v154_v55  ;;  %v171_v2 = vadd.f32 %v894_v8, %v155_v56  ;;  %v765_v13 = vld [vmem:[%s1131_s0 + $0x48] sm:$0xff]  }
  0x13   :  { %v105_v4 = vmax.f32 %v89_v57, 0.0  ;;  %v106_v5 = vmax.f32 %v90_v58, 0.0  ;;  %v267_v6 = vadd.f32 %v894_v8, %v251_v59  ;;  %v268_v7 = vadd.f32 %v894_v8, %v252_v60  ;;  %v773_v26 = vld [vmem:[%s1131_s0 + $0x88] sm:$0xff]  }
  0x14   :  { %v404_v9 = vpack.c.bf16 %v389_v63, %v388_v62  ;;  %v186_v10 = vmax.f32 %v170_v0, 0.0  ;;  %v187_v11 = vmax.f32 %v171_v2, 0.0  ;;  %v743_v12 = vunpack.c.l.bf16 %v784_v61  ;;  %v781_v39 = vld [vmem:[%s1131_s0 + $0xc8] sm:$0xff]  }
  0x15   :  { %v283_v14 = vmax.f32 %v267_v6, 0.0  ;;  %v284_v15 = vmax.f32 %v268_v7, 0.0  ;;  %v744_v16 = vunpack.c.h.bf16 %v784_v61  ;;  %v635_v17 = vunpack.c.l.bf16 %v757_v3  ;;  %v761_v44 = vld [vmem:[%s1131_s0 + $0x28] sm:$0xff]  }
  0x16   :  { %799 = vmatprep.mubr.msk.bf16.mxu0 %vm413_vm1, %v404_v9  ;;  %v202_v18 = vadd.f32 %v186_v10, %v105_v4  ;;  %v203_v19 = vadd.f32 %v187_v11, %v106_v5  ;;  %v348_v20 = vmul.f32 %v743_v12, %v880_v1  ;;  %v636_v21 = vunpack.c.h.bf16 %v757_v3  ;;  %v769_v57 = vld [vmem:[%s1131_s0 + $0x68] sm:$0xff]  }
  0x17   :  { %v349_v22 = vmul.f32 %v744_v16, %v880_v1  ;;  %v61_v23 = vmul.f32 %v635_v17, %v880_v1  ;;  %v667_v24 = vunpack.c.l.bf16 %v765_v13  ;;  %v668_v25 = vunpack.c.h.bf16 %v765_v13  ;;  %v777_v7 = vld [vmem:[%s1131_s0 + $0xa8] sm:$0xff]  }
  0x18   :  { %v299_v27 = vadd.f32 %v283_v14, %v202_v18  ;;  %v300_v28 = vadd.f32 %v284_v15, %v203_v19  ;;  %v364_v29 = vadd.f32 %v894_v8, %v348_v20  ;;  %v62_v30 = vmul.f32 %v636_v21, %v880_v1  ;;  %v785_v21 = vld [vmem:[%s1131_s0 + $0xe8] sm:$0xff]  }
  0x19   :  { %v365_v31 = vadd.f32 %v894_v8, %v349_v22  ;;  %v83_v32 = vadd.f32 %v894_v8, %v61_v23  ;;  %v148_v33 = vmul.f32 %v667_v24, %v880_v1  ;;  %v149_v34 = vmul.f32 %v668_v25, %v880_v1 }
  0x1a   :  { %v380_v35 = vmax.f32 %v364_v29, 0.0  ;;  %v84_v36 = vadd.f32 %v894_v8, %v62_v30  ;;  %v699_v37 = vunpack.c.l.bf16 %v773_v26  ;;  %v700_v38 = vunpack.c.h.bf16 %v773_v26  ;;  %v758_v26 = vld [vmem:[%s1131_s0 + $0x10] sm:$0xff]  }
  0x1b   :  { %v381_v40 = vmax.f32 %v365_v31, 0.0  ;;  %v99_v41 = vmax.f32 %v83_v32, 0.0  ;;  %v164_v42 = vadd.f32 %v894_v8, %v148_v33  ;;  %v165_v43 = vadd.f32 %v894_v8, %v149_v34 }
  0x1c   :  { %v396_v45 = vadd.f32 %v380_v35, %v299_v27  ;;  %v100_v46 = vmax.f32 %v84_v36, 0.0  ;;  %v245_v47 = vmul.f32 %v699_v37, %v880_v1  ;;  %v246_v48 = vmul.f32 %v700_v38, %v880_v1 }
  0x1d   :  { %v397_v49 = vadd.f32 %v381_v40, %v300_v28  ;;  %v180_v50 = vmax.f32 %v164_v42, 0.0  ;;  %v181_v51 = vmax.f32 %v165_v43, 0.0  ;;  %v731_v52 = vunpack.c.l.bf16 %v781_v39 }
  0x1e   :  { %v261_v53 = vadd.f32 %v894_v8, %v245_v47  ;;  %v262_v54 = vadd.f32 %v894_v8, %v246_v48  ;;  %v732_v55 = vunpack.c.h.bf16 %v781_v39  ;;  %v651_v56 = vunpack.c.l.bf16 %v761_v44  ;;  %v766_v39 = vld [vmem:[%s1131_s0 + $0x50] sm:$0xff]  }
  0x1f   :  { %v408_v58 = vpack.c.bf16 %v397_v49, %v396_v45  ;;  %v196_v59 = vadd.f32 %v180_v50, %v99_v41  ;;  %v197_v60 = vadd.f32 %v181_v51, %v100_v46  ;;  %v342_v61 = vmul.f32 %v731_v52, %v880_v1  ;;  %v774_v52 = vld [vmem:[%s1131_s0 + $0x90] sm:$0xff]  }
  0x20   :  { %v277_v62 = vmax.f32 %v261_v53, 0.0  ;;  %v278_v63 = vmax.f32 %v262_v54, 0.0  ;;  %v343_v0 = vmul.f32 %v732_v55, %v880_v1  ;;  %v652_v2 = vunpack.c.h.bf16 %v761_v44 }
  0x21   :  { %807 = vmatprep.mubr.msk.bf16.mxu1 %vm413_vm1, %v408_v58  ;;  %v358_v3 = vadd.f32 %v894_v8, %v342_v61  ;;  %v69_v4 = vmul.f32 %v651_v56, %v880_v1  ;;  %v683_v5 = vunpack.c.l.bf16 %v769_v57  ;;  %v684_v6 = vunpack.c.h.bf16 %v769_v57  ;;  %v782_v61 = vld [vmem:[%s1131_s0 + $0xd0] sm:$0xff]  }
  0x22   :  { %v293_v9 = vadd.f32 %v277_v62, %v196_v59  ;;  %v294_v10 = vadd.f32 %v278_v63, %v197_v60  ;;  %v359_v11 = vadd.f32 %v894_v8, %v343_v0  ;;  %v70_v12 = vmul.f32 %v652_v2, %v880_v1 }
  0x23   :  { %v374_v13 = vmax.f32 %v358_v3, 0.0  ;;  %v91_v14 = vadd.f32 %v894_v8, %v69_v4  ;;  %v156_v15 = vmul.f32 %v683_v5, %v880_v1  ;;  %v157_v16 = vmul.f32 %v684_v6, %v880_v1 }
  0x24   :  { %v375_v17 = vmax.f32 %v359_v11, 0.0  ;;  %v92_v18 = vadd.f32 %v894_v8, %v70_v12  ;;  %v715_v19 = vunpack.c.l.bf16 %v777_v7  ;;  %v716_v20 = vunpack.c.h.bf16 %v777_v7  ;;  %v762_v7 = vld [vmem:[%s1131_s0 + $0x30] sm:$0xff]  }
  0x25   :  { %v390_v22 = vadd.f32 %v374_v13, %v293_v9  ;;  %v107_v23 = vmax.f32 %v91_v14, 0.0  ;;  %v172_v24 = vadd.f32 %v894_v8, %v156_v15  ;;  %v173_v25 = vadd.f32 %v894_v8, %v157_v16 }
  0x26   :  { %v391_v27 = vadd.f32 %v375_v17, %v294_v10  ;;  %v108_v28 = vmax.f32 %v92_v18, 0.0  ;;  %v253_v29 = vmul.f32 %v715_v19, %v880_v1  ;;  %v254_v30 = vmul.f32 %v716_v20, %v880_v1 }
  0x27   :  { %v188_v31 = vmax.f32 %v172_v24, 0.0  ;;  %v189_v32 = vmax.f32 %v173_v25, 0.0  ;;  %v747_v33 = vunpack.c.l.bf16 %v785_v21  ;;  %v748_v34 = vunpack.c.h.bf16 %v785_v21  ;;  %v770_v21 = vld [vmem:[%s1131_s0 + $0x70] sm:$0xff]  }
  0x28   :  { %v405_v35 = vpack.c.bf16 %v391_v27, %v390_v22  ;;  %v269_v36 = vadd.f32 %v894_v8, %v253_v29  ;;  %v270_v37 = vadd.f32 %v894_v8, %v254_v30  ;;  %v639_v38 = vunpack.c.l.bf16 %v758_v26 }
  0x29   :  { %v204_v40 = vadd.f32 %v188_v31, %v107_v23  ;;  %v205_v41 = vadd.f32 %v189_v32, %v108_v28  ;;  %v350_v42 = vmul.f32 %v747_v33, %v880_v1  ;;  %v351_v43 = vmul.f32 %v748_v34, %v880_v1  ;;  %v778_v34 = vld [vmem:[%s1131_s0 + $0xb0] sm:$0xff]  }
  0x2a   :  { %800 = vmatmul.mubr.msk.bf16.vlgmr.msra.gmra.mrb[0].mxu0 %vm413_vm1, %v405_v35  ;;  %v285_v44 = vmax.f32 %v269_v36, 0.0  ;;  %v286_v45 = vmax.f32 %v270_v37, 0.0  ;;  %v640_v46 = vunpack.c.h.bf16 %v758_v26  ;;  %v63_v47 = vmul.f32 %v639_v38, %v880_v1 }
  0x2b   :  { %v366_v48 = vadd.f32 %v894_v8, %v350_v42  ;;  %v367_v49 = vadd.f32 %v894_v8, %v351_v43  ;;  %v671_v50 = vunpack.c.l.bf16 %v766_v39  ;;  %v672_v51 = vunpack.c.h.bf16 %v766_v39  ;;  %v786_v43 = vld [vmem:[%s1131_s0 + $0xf0] sm:$0xff]  }
  0x2c   :  { %v301_v53 = vadd.f32 %v285_v44, %v204_v40  ;;  %v302_v54 = vadd.f32 %v286_v45, %v205_v41  ;;  %v64_v55 = vmul.f32 %v640_v46, %v880_v1  ;;  %v85_v56 = vadd.f32 %v894_v8, %v63_v47 }
  0x2d   :  { %v382_v57 = vmax.f32 %v366_v48, 0.0  ;;  %v383_v58 = vmax.f32 %v367_v49, 0.0  ;;  %v150_v59 = vmul.f32 %v671_v50, %v880_v1  ;;  %v151_v60 = vmul.f32 %v672_v51, %v880_v1  ;;  %v759_v48 = vld [vmem:[%s1131_s0 + $0x18] sm:$0xff]  }
  0x2e   :  { %v86_v62 = vadd.f32 %v894_v8, %v64_v55  ;;  %v101_v63 = vmax.f32 %v85_v56, 0.0  ;;  %v703_v0 = vunpack.c.l.bf16 %v774_v52  ;;  %v704_v2 = vunpack.c.h.bf16 %v774_v52 }
  0x2f   :  { %v398_v3 = vadd.f32 %v382_v57, %v301_v53  ;;  %v399_v4 = vadd.f32 %v383_v58, %v302_v54  ;;  %v166_v5 = vadd.f32 %v894_v8, %v150_v59  ;;  %v167_v6 = vadd.f32 %v894_v8, %v151_v60 }
  0x30   :  { %v102_v9 = vmax.f32 %v86_v62, 0.0  ;;  %v247_v10 = vmul.f32 %v703_v0, %v880_v1  ;;  %v248_v11 = vmul.f32 %v704_v2, %v880_v1  ;;  %v735_v12 = vunpack.c.l.bf16 %v782_v61  ;;  %v767_v2 = vld [vmem:[%s1131_s0 + $0x58] sm:$0xff]  }
  0x31   :  { %v409_v13 = vpack.c.bf16 %v399_v4, %v398_v3  ;;  %v182_v14 = vmax.f32 %v166_v5, 0.0  ;;  %v183_v15 = vmax.f32 %v167_v6, 0.0  ;;  %v736_v16 = vunpack.c.h.bf16 %v782_v61 }
  0x32   :  { %v263_v17 = vadd.f32 %v894_v8, %v247_v10  ;;  %v264_v18 = vadd.f32 %v894_v8, %v248_v11  ;;  %v344_v19 = vmul.f32 %v735_v12, %v880_v1  ;;  %v655_v20 = vunpack.c.l.bf16 %v762_v7 }
  0x33   :  { %808 = vmatmul.mubr.msk.bf16.vlgmr.msra.gmra.mrb[0].mxu1 %vm413_vm1, %v409_v13  ;;  %v198_v22 = vadd.f32 %v182_v14, %v101_v63  ;;  %v199_v23 = vadd.f32 %v183_v15, %v102_v9  ;;  %v345_v24 = vmul.f32 %v736_v16, %v880_v1  ;;  %v656_v25 = vunpack.c.h.bf16 %v762_v7  ;;  %v775_v16 = vld [vmem:[%s1131_s0 + $0x98] sm:$0xff]  }
  0x34   :  { %v279_v26 = vmax.f32 %v263_v17, 0.0  ;;  %v280_v27 = vmax.f32 %v264_v18, 0.0  ;;  %v360_v28 = vadd.f32 %v894_v8, %v344_v19  ;;  %v71_v29 = vmul.f32 %v655_v20, %v880_v1 }
  0x35   :  { %v361_v30 = vadd.f32 %v894_v8, %v345_v24  ;;  %v72_v31 = vmul.f32 %v656_v25, %v880_v1  ;;  %v687_v32 = vunpack.c.l.bf16 %v770_v21  ;;  %v688_v33 = vunpack.c.h.bf16 %v770_v21  ;;  %v783_v21 = vld [vmem:[%s1131_s0 + $0xd8] sm:$0xff]  }
  0x36   :  { %v295_v35 = vadd.f32 %v279_v26, %v198_v22  ;;  %v296_v36 = vadd.f32 %v280_v27, %v199_v23  ;;  %v376_v37 = vmax.f32 %v360_v28, 0.0  ;;  %v93_v38 = vadd.f32 %v894_v8, %v71_v29 }
  0x37   :  { %v377_v39 = vmax.f32 %v361_v30, 0.0  ;;  %v94_v40 = vadd.f32 %v894_v8, %v72_v31  ;;  %v158_v41 = vmul.f32 %v687_v32, %v880_v1  ;;  %v159_v42 = vmul.f32 %v688_v33, %v880_v1  ;;  %v763_v30 = vld [vmem:[%s1131_s0 + $0x38] sm:$0xff]  }
  0x38   :  { %v392_v44 = vadd.f32 %v376_v37, %v295_v35  ;;  %v109_v45 = vmax.f32 %v93_v38, 0.0  ;;  %v719_v46 = vunpack.c.l.bf16 %v778_v34  ;;  %v720_v47 = vunpack.c.h.bf16 %v778_v34 }
  0x39   :  { %v393_v49 = vadd.f32 %v377_v39, %v296_v36  ;;  %v110_v50 = vmax.f32 %v94_v40, 0.0  ;;  %v174_v51 = vadd.f32 %v894_v8, %v158_v41  ;;  %v175_v52 = vadd.f32 %v894_v8, %v159_v42 }
  0x3a   :  { %v255_v53 = vmul.f32 %v719_v46, %v880_v1  ;;  %v256_v54 = vmul.f32 %v720_v47, %v880_v1  ;;  %v751_v55 = vunpack.c.l.bf16 %v786_v43  ;;  %v752_v56 = vunpack.c.h.bf16 %v786_v43  ;;  %v771_v47 = vld [vmem:[%s1131_s0 + $0x78] sm:$0xff]  }
  0x3b   :  { %v406_v57 = vpack.c.bf16 %v393_v49, %v392_v44  ;;  %v190_v58 = vmax.f32 %v174_v51, 0.0  ;;  %v191_v59 = vmax.f32 %v175_v52, 0.0  ;;  %v643_v60 = vunpack.c.l.bf16 %v759_v48 }
  0x3c   :  { %v271_v61 = vadd.f32 %v894_v8, %v255_v53  ;;  %v272_v62 = vadd.f32 %v894_v8, %v256_v54  ;;  %v352_v63 = vmul.f32 %v751_v55, %v880_v1  ;;  %v353_v0 = vmul.f32 %v752_v56, %v880_v1  ;;  %v779_v56 = vld [vmem:[%s1131_s0 + $0xb8] sm:$0xff]  }
  0x3d   :  { %803 = vmatprep.mubr.msk.bf16.mxu0 %vm413_vm1, %v406_v57  ;;  %v206_v3 = vadd.f32 %v190_v58, %v109_v45  ;;  %v207_v4 = vadd.f32 %v191_v59, %v110_v50  ;;  %v644_v5 = vunpack.c.h.bf16 %v759_v48  ;;  %v65_v6 = vmul.f32 %v643_v60, %v880_v1 }
  0x3e   :  { %v287_v7 = vmax.f32 %v271_v61, 0.0  ;;  %v288_v9 = vmax.f32 %v272_v62, 0.0  ;;  %v368_v10 = vadd.f32 %v894_v8, %v352_v63  ;;  %v369_v11 = vadd.f32 %v894_v8, %v353_v0 }
  0x3f   :  { %v66_v12 = vmul.f32 %v644_v5, %v880_v1  ;;  %v87_v13 = vadd.f32 %v894_v8, %v65_v6  ;;  %v675_v14 = vunpack.c.l.bf16 %v767_v2  ;;  %v676_v15 = vunpack.c.h.bf16 %v767_v2  ;;  %v787_v2 = vld [vmem:[%s1131_s0 + $0xf8] sm:$0xff]   ;;  %s846_s0 = smov [#allocation2]  }
  0x40   :  { %v303_v17 = vadd.f32 %v287_v7, %v206_v3  ;;  %v304_v18 = vadd.f32 %v288_v9, %v207_v4  ;;  %v384_v19 = vmax.f32 %v368_v10, 0.0  ;;  %v385_v20 = vmax.f32 %v369_v11, 0.0  ;;  %s560_s25 = sshll.u32 %s846_s0, 4  ;;  %s561_s25 = int_to_ptr.vmem [resolvable:$true] %s560_s25 }
  0x41   :  { %v88_v22 = vadd.f32 %v894_v8, %v66_v12  ;;  %v103_v23 = vmax.f32 %v87_v13, 0.0  ;;  %v152_v24 = vmul.f32 %v675_v14, %v880_v1  ;;  %v153_v25 = vmul.f32 %v676_v15, %v880_v1  ;;  %s822_s26 = scalar_lea.vmem %s561_s25, 2048  ;;  %p827_p1 = scmp.lt.s32.totalorder %s561_s25, %s561_s25 }
  0x42   :  { %v400_v26 = vadd.f32 %v384_v19, %v303_v17  ;;  %v401_v27 = vadd.f32 %v385_v20, %v304_v18  ;;  %v707_v28 = vunpack.c.l.bf16 %v775_v16  ;;  %v708_v29 = vunpack.c.h.bf16 %v775_v16  ;;  %p823_p0 = scmp.ne.s32.totalorder %s561_s25, %s822_s26  ;;  %p828_p2 = scmp.lt.s32.totalorder %s822_s26, %s822_s26 }
  0x43   :  { %v104_v31 = vmax.f32 %v88_v22, 0.0  ;;  %v168_v32 = vadd.f32 %v894_v8, %v152_v24  ;;  %v169_v33 = vadd.f32 %v894_v8, %v153_v25  ;;  %v739_v34 = vunpack.c.l.bf16 %v783_v21 }
  0x44   :  { %v410_v35 = vpack.c.bf16 %v401_v27, %v400_v26  ;;  %v249_v36 = vmul.f32 %v707_v28, %v880_v1  ;;  %v250_v37 = vmul.f32 %v708_v29, %v880_v1  ;;  %v740_v38 = vunpack.c.h.bf16 %v783_v21  ;;  %p829_p3 = por %p828_p2, %p827_p1 }
  0x45   :  { %v184_v39 = vmax.f32 %v168_v32, 0.0  ;;  %v185_v40 = vmax.f32 %v169_v33, 0.0  ;;  %v346_v41 = vmul.f32 %v739_v34, %v880_v1  ;;  %v659_v42 = vunpack.c.l.bf16 %v763_v30 }
  0x46   :  { %811 = vmatprep.mubr.msk.bf16.mxu1 %vm413_vm1, %v410_v35  ;;  %v265_v43 = vadd.f32 %v894_v8, %v249_v36  ;;  %v266_v44 = vadd.f32 %v894_v8, %v250_v37  ;;  %v347_v45 = vmul.f32 %v740_v38, %v880_v1  ;;  %v660_v46 = vunpack.c.h.bf16 %v763_v30  ;;  %p830_p4 = pnand %p829_p3, %p823_p0 }
  0x47   :  { %v200_v48 = vadd.f32 %v184_v39, %v103_v23  ;;  %v201_v49 = vadd.f32 %v185_v40, %v104_v31  ;;  %v362_v50 = vadd.f32 %v894_v8, %v346_v41  ;;  %v73_v51 = vmul.f32 %v659_v42, %v880_v1 }
  0x48   :  { %v281_v52 = vmax.f32 %v265_v43, 0.0  ;;  %v282_v53 = vmax.f32 %v266_v44, 0.0  ;;  %v363_v54 = vadd.f32 %v894_v8, %v347_v45  ;;  %v74_v55 = vmul.f32 %v660_v46, %v880_v1 }
  0x49   :  { %v378_v57 = vmax.f32 %v362_v50, 0.0  ;;  %v95_v58 = vadd.f32 %v894_v8, %v73_v51  ;;  %v691_v59 = vunpack.c.l.bf16 %v771_v47  ;;  %v692_v60 = vunpack.c.h.bf16 %v771_v47 }
  0x4a   :  { %v297_v61 = vadd.f32 %v281_v52, %v200_v48  ;;  %v298_v62 = vadd.f32 %v282_v53, %v201_v49  ;;  %v379_v63 = vmax.f32 %v363_v54, 0.0  ;;  %v96_v0 = vadd.f32 %v894_v8, %v74_v55 }
  0x4b   :  { %v111_v3 = vmax.f32 %v95_v58, 0.0  ;;  %v160_v4 = vmul.f32 %v691_v59, %v880_v1  ;;  %v161_v5 = vmul.f32 %v692_v60, %v880_v1  ;;  %v723_v6 = vunpack.c.l.bf16 %v779_v56 }
  0x4c   :  { %v394_v7 = vadd.f32 %v378_v57, %v297_v61  ;;  %v395_v9 = vadd.f32 %v379_v63, %v298_v62  ;;  %v112_v10 = vmax.f32 %v96_v0, 0.0  ;;  %v724_v11 = vunpack.c.h.bf16 %v779_v56 }
  0x4d   :  { %v176_v12 = vadd.f32 %v894_v8, %v160_v4  ;;  %v177_v13 = vadd.f32 %v894_v8, %v161_v5  ;;  %v257_v14 = vmul.f32 %v723_v6, %v880_v1  ;;  %v755_v15 = vunpack.c.l.bf16 %v787_v2 }
  0x4e   :  { %v407_v16 = vpack.c.bf16 %v395_v9, %v394_v7  ;;  %v258_v17 = vmul.f32 %v724_v11, %v880_v1  ;;  %v756_v18 = vunpack.c.h.bf16 %v787_v2 }
  0x4f   :  { %v192_v19 = vmax.f32 %v176_v12, 0.0  ;;  %v193_v20 = vmax.f32 %v177_v13, 0.0  ;;  %v273_v21 = vadd.f32 %v894_v8, %v257_v14  ;;  %v354_v22 = vmul.f32 %v755_v15, %v880_v1 }
  0x50   :  { %804 = vmatmul.mubr.msk.bf16.gmra.mrb[4].mxu0 %vm413_vm1, %v407_v16  ;;  %v274_v23 = vadd.f32 %v894_v8, %v258_v17  ;;  %v355_v24 = vmul.f32 %v756_v18, %v880_v1 }
  0x51   :  { %v208_v25 = vadd.f32 %v192_v19, %v111_v3  ;;  %v209_v26 = vadd.f32 %v193_v20, %v112_v10  ;;  %v289_v27 = vmax.f32 %v273_v21, 0.0  ;;  %v370_v28 = vadd.f32 %v894_v8, %v354_v22 }
  0x52   :  { %v290_v29 = vmax.f32 %v274_v23, 0.0  ;;  %v371_v30 = vadd.f32 %v894_v8, %v355_v24 }
  0x53   :  { %v305_v31 = vadd.f32 %v289_v27, %v208_v25  ;;  %v386_v32 = vmax.f32 %v370_v28, 0.0 }
  0x54   :  { %v306_v33 = vadd.f32 %v290_v29, %v209_v26  ;;  %v387_v34 = vmax.f32 %v371_v30, 0.0 }
  0x55   :  { %v402_v35 = vadd.f32 %v386_v32, %v305_v31 }
  0x56   :  { %v403_v36 = vadd.f32 %v387_v34, %v306_v33 }
  0x58   :  { %v411_v37 = vpack.c.bf16 %v403_v36, %v402_v35 }
  0x5a   :  { %812 = vmatmul.mubr.msk.bf16.gmra.mrb[4].mxu1 %vm413_vm1, %v411_v37 }
  0xfd   :  { %v801_v38 = vpop.f32.mrb[0].mxu0 }
  0xfe   :  { %541 = vst [vmem:[#allocation2 + $0x10] sm:$0xff] %v801_v38  ;;  %v476_v1 = vpop.f32.mrb[1].mxu0 }
  0xff   :  { %539 = vst [vmem:[#allocation2] sm:$0xff] %v476_v1  ;;  %v802_v39 = vpop.f32.mrb[2].mxu0 }
 0x100   :  { %542 = vst [vmem:[#allocation2 + $0x18] sm:$0xff] %v802_v39  ;;  %v479_v40 = vpop.f32.mrb[3].mxu0 }
 0x101   :  { %540 = vst [vmem:[#allocation2 + $0x8] sm:$0xff] %v479_v40 }
 0x106   :  { %v809_v41 = vpop.f32.mrb[0].mxu1 }
 0x107   :  { %549 = vst [vmem:[#allocation2 + $0x50] sm:$0xff] %v809_v41  ;;  %v508_v8 = vpop.f32.mrb[1].mxu1 }
 0x108   :  { %547 = vst [vmem:[#allocation2 + $0x40] sm:$0xff] %v508_v8  ;;  %v810_v42 = vpop.f32.mrb[2].mxu1 }
 0x109   :  { %550 = vst [vmem:[#allocation2 + $0x58] sm:$0xff] %v810_v42  ;;  %v511_v43 = vpop.f32.mrb[3].mxu1 }
 0x10a   :  { %548 = vst [vmem:[#allocation2 + $0x48] sm:$0xff] %v511_v43 }
 0x123   :  { %v805_v44 = vpop.f32.mrb[4].mxu0 }
 0x124   :  { %545 = vst [vmem:[#allocation2 + $0x30] sm:$0xff] %v805_v44  ;;  %v492_v45 = vpop.f32.mrb[5].mxu0 }
 0x125   :  { %543 = vst [vmem:[#allocation2 + $0x20] sm:$0xff] %v492_v45  ;;  %v806_v46 = vpop.f32.mrb[6].mxu0 }
 0x126   :  { %546 = vst [vmem:[#allocation2 + $0x38] sm:$0xff] %v806_v46  ;;  %v495_v47 = vpop.f32.mrb[7].mxu0 }
 0x127   :  { %544 = vst [vmem:[#allocation2 + $0x28] sm:$0xff] %v495_v47 }
 0x12d   :  { %v813_v48 = vpop.f32.mrb[4].mxu1 }
 0x12e   :  { %553 = vst [vmem:[#allocation2 + $0x70] sm:$0xff] %v813_v48  ;;  %v524_v49 = vpop.f32.mrb[5].mxu1 }
 0x12f   :  { %551 = vst [vmem:[#allocation2 + $0x60] sm:$0xff] %v524_v49  ;;  %v814_v50 = vpop.f32.mrb[6].mxu1 }
 0x130   :  { %554 = vst [vmem:[#allocation2 + $0x78] sm:$0xff] %v814_v50  ;;  %v527_v51 = vpop.f32.mrb[7].mxu1 }
 0x131   :  { %552 = vst [vmem:[#allocation2 + $0x68] sm:$0xff] %v527_v51 }
 0x132   :  { %833 = shalt.err (!%p830_p4)
}
 0x133   :  { %s834_s28 = scalar_lea.hbm %s1135_s4, 2048 }
 0x134   :  { %p835_p5 = scmp.ne.s32.totalorder %s1135_s4, %s834_s28  ;;  %p838_p6 = scmp.lt.u32.totalorder %s834_s28, %s1135_s4 }
 0x136   :  { %p840_p7 = pnand %p838_p6, %p835_p5 }
 0x138   :  { %843 = shalt.err (!%p840_p7)
}
 0x139   :  { %s847_s7 = smov 128   ;;  %s848_s8 = smov 8  }
 0x13a   :  { %566 = dma.vmem_to_hbm [thread:$0]  %s561_s25, 2048, %s1135_s4, [#allocation3], %s847_s7, %s847_s7, %s848_s8  }
 0x13b   :  { %844 = dma.done.wait [#allocation3], 2048  }
 0x13c   :  { %845 = vsyncadd [#allocation3], 4294965248 }
 0x13d   :  { %570 = vsyncpa [#allocation3], 1 }

</bundles_post_ra>
